<compile_context>
chip_gen: v7x
topology: tpu7x:2x2x1
jax: 0.10.0
libtpu: 0.0.40
codegen_flags: <defaults>
</compile_context>

<pallas_src>
import functools

import jax
import jax.numpy as jnp
from jax.experimental import pallas as pl
from jax.experimental.pallas import tpu as pltpu

EPS = 1e-5          # nn.BatchNorm2d default eps
NCONV = 4           # four kernel shapes per branch

# conv j -> kernel size / pad (top, bottom, left, right); F.pad order in the module is
# (left, right, top, bottom) -- these match the PyTorch forward exactly.
KERNEL_SIZES = ((3, 3), (2, 3), (3, 2), (2, 2))
PADS = ((1, 1, 1, 1), (1, 0, 1, 1), (1, 1, 1, 0), (1, 0, 1, 0))

VMEM_LIMIT_BYTES = 32 * 1024 * 1024    # explicit scoped-VMEM limit (safe on v5e/v6e/v7x)
BLOCK_BUDGET_BYTES = 8 * 1024 * 1024   # per-call budget for double-buffered lane blocks


# --------------------------------------------------------------------------------------
# pltpu.roll direction probe (cached): we need xs[l] = x[l + off] for static off.
# --------------------------------------------------------------------------------------
@functools.cache
def _roll_matches_np() -> bool:
    """True iff pltpu.roll(x, s, a)[i] == x[i - s]  (numpy.roll semantics)."""
    def k(x_ref, o_ref):
        o_ref[...] = pltpu.roll(x_ref[...], 1, 1)

    x = jnp.tile(jnp.arange(128, dtype=jnp.float32)[None, :], (8, 1))
    out = pl.pallas_call(k, out_shape=jax.ShapeDtypeStruct((8, 128), jnp.float32))(x)
    v = float(out[0, 0])
    assert v in (127.0, 1.0), v
    return v == 127.0


# --------------------------------------------------------------------------------------
# Pallas kernels
# --------------------------------------------------------------------------------------
def _conv3x3_stats_kernel(x_ref, w_ref, b_ref, si_ref, ti_ref,
                          mt_ref, mb_ref, ml_ref, mr_ref,
                          y_ref, s_ref, q_ref, *,
                          img_w, add_bias, in_affine_relu, np_roll, cdtype):
    """One lane tile of a 3x3/pad-1 convolution as 9 shifted-tap MXU matmuls.

    Writes the raw (pre-BatchNorm) output tile and accumulates per-row BN statistics
    across the grid (resident accumulator output blocks).

    x_ref          : (Cin, T)   input tile; lanes = flattened (n, y, x), whole images only
    w_ref          : (9, Cout, Cin) per-tap weights, tap k = 3*dy + dx
    b_ref          : (Cout, 1)  conv bias (read iff add_bias)
    si_ref, ti_ref : (Cin, 1)   input scale/shift (read iff in_affine_relu): x<-relu(x*s+t)
    m*_ref         : (1, T)     {0,1} image-boundary masks (top / bottom / left / right)
    y_ref          : (Cout, T)  raw conv output tile (lane-dense store)
    s_ref, q_ref   : (Cout, 1)  running per-row sum / sum-of-squares
    """
    x = x_ref[...]
    if in_affine_relu:                              # fused bn1_1 + ReLU on the input tile
        x = jnp.maximum(x.astype(jnp.float32) * si_ref[...] + ti_ref[...], 0.0)
    x = x.astype(cdtype)
    t = x.shape[1]

    mrow = (mt_ref[...], None, mb_ref[...])         # used by taps with dy = 0 / 2
    mcol = (ml_ref[...], None, mr_ref[...])         # used by taps with dx = 0 / 2

    acc = jnp.zeros(y_ref.shape, jnp.float32)
    for dy in range(3):
        for dx in range(3):
            off = (dy - 1) * img_w + (dx - 1)       # lane offset of this tap's input
            if off == 0:
                xs = x
            else:
                # want xs[l] = x[l + off]; lanes that wrap around the tile correspond to
                # image-boundary positions and are zeroed by the masks below.
                amt = ((-off) if np_roll else off) % t
                xs = pltpu.roll(x, amt, 1)
            fac = mrow[dy]
            if mcol[dx] is not None:
                fac = mcol[dx] if fac is None else fac * mcol[dx]
            if fac is not None:
                xs = xs * fac
            acc = acc + jnp.dot(w_ref[3 * dy + dx], xs,
                                preferred_element_type=jnp.float32)
    if add_bias:
        acc = acc + b_ref[...]

    y_ref[...] = acc.astype(y_ref.dtype)

    @pl.when(pl.program_id(0) == 0)
    def _init():
        s_ref[...] = jnp.zeros_like(s_ref)
        q_ref[...] = jnp.zeros_like(q_ref)

    s_ref[...] += jnp.sum(acc, axis=1, keepdims=True)
    q_ref[...] += jnp.sum(acc * acc, axis=1, keepdims=True)


def _bn_apply_add_relu_kernel(y3_ref, y2_ref, s3_ref, t3_ref, s2_ref, t2_ref, o_ref):
    """out = relu( bn2(conv3_out) + bn1_2(branch2) ); scale/shift precomputed per channel."""
    b1 = y3_ref[...].astype(jnp.float32) * s3_ref[...] + t3_ref[...]
    b2 = y2_ref[...].astype(jnp.float32) * s2_ref[...] + t2_ref[...]
    o_ref[...] = jnp.maximum(b1 + b2, 0.0)


# --------------------------------------------------------------------------------------
# Wrapper helpers
# --------------------------------------------------------------------------------------
def _pick_images_per_tile(n_images, img_pix, lane_bytes):
    """Whole images per grid step: the lane tile (ipb*img_pix) must be a multiple of 128;
    grow it while the (double-buffered) blocks fit the per-call VMEM budget."""
    valid = [d for d in range(1, n_images + 1)
             if n_images % d == 0 and (d * img_pix) % 128 == 0]
    if not valid:
        # TODO(synk): pad the lane axis to a 128 multiple (and pass the true element count
        #             for the BN divisor) instead of falling back to one whole-array block.
        return n_images
    best = valid[0]
    for d in valid:
        if 2 * d * img_pix * lane_bytes <= BLOCK_BUDGET_BYTES:
            best = d
    return best


def _pick_lane_tile(total, lane_bytes, max_tile=8192):
    best = None
    t = 128
    while t <= min(total, max_tile):
        if total % t == 0 and 2 * t * lane_bytes <= BLOCK_BUDGET_BYTES:
            best = t
        t += 128
    return best if best is not None else total


def _boundary_masks(h, w, tile, dtype):
    """Four (1, tile) {0,1} masks for a lane tile made of whole (h, w) images:
    [y>=1, y<=h-2, x>=1, x<=w-2]."""
    lane = jnp.arange(tile, dtype=jnp.int32)
    xx = lane % w
    yy = (lane // w) % h
    row = lambda b: b.astype(dtype).reshape(1, tile)
    return row(yy >= 1), row(yy <= h - 2), row(xx >= 1), row(xx <= w - 2)


def _pixel_shuffle(z, cout, n, h, w):
    """z:(4*cout, n*h*w), row = (2*dy+dx)*cout + ch  ->  (cout, n*2h*2w) NCHW-flattened."""
    z = z.reshape(2, 2, cout, n, h, w)
    z = jnp.transpose(z, (2, 3, 4, 0, 5, 1))          # (cout, n, h, dy, w, dx)
    return z.reshape(cout, n * 2 * h * 2 * w)


def _scale_shift(sum_, sumsq, count, gamma, beta):
    """Fused train-mode BN affine: y_norm = y*scale + shift."""
    mean = sum_ / count
    # TODO(synk): E[y^2]-E[y]^2 in f32 is cancellation-prone when |mean| >> std; switch to
    #             a shifted / Welford accumulation if realistic activations need it.
    var = sumsq / count - mean * mean
    scale = gamma * jax.lax.rsqrt(var + EPS)
    return scale, beta - mean * scale


def pack_upproject_params(params, compute_dtype=jnp.float32):
    """Weight packing (activation-independent, do once): zero-embed the four kernel shapes
    into 3x3 taps shared by all 8 stage-1 convs, plus conv3 taps and f32 BN params."""
    cout, cin = params["w1_1"].shape[:2]
    taps1, bias1 = [], []
    for branch in ("1", "2"):
        for j, (kh, kw) in enumerate(KERNEL_SIZES):
            wj = params[f"w{branch}_{j + 1}"].astype(jnp.float32)
            # Exact: given the asymmetric pads, each conv equals a 3x3/pad-1 conv with the
            # kernel zero-embedded at the bottom/right.
            wj = jnp.pad(wj, ((0, 0), (0, 0), (0, 3 - kh), (0, 3 - kw)))
            taps1.append(wj)
            bias1.append(params[f"b{branch}_{j + 1}"].astype(jnp.float32))
    w1 = jnp.concatenate(taps1, axis=0)                                    # (8c, cin, 3, 3)
    w1 = jnp.transpose(w1, (2, 3, 0, 1)).reshape(9, 2 * NCONV * cout, cin)
    b1 = jnp.concatenate(bias1, axis=0).reshape(2 * NCONV * cout, 1)
    w3 = jnp.transpose(params["w3"].astype(jnp.float32), (2, 3, 0, 1)).reshape(9, cout, cout)
    vec = lambda k: params[k].astype(jnp.float32).reshape(cout, 1)
    return dict(cout=cout, cin=cin,
                w1=w1.astype(compute_dtype), b1=b1, w3=w3.astype(compute_dtype),
                g1_1=vec("g1_1"), be1_1=vec("be1_1"),
                g1_2=vec("g1_2"), be1_2=vec("be1_2"),
                g2=vec("g2"), be2=vec("be2"))


def _conv3x3_stats(x_flat, taps, bias, s_in, t_in, *, h, w, n_images,
                   add_bias, in_affine_relu, out_dtype, compute_dtype,
                   images_per_tile=None):
    """pallas_call plumbing for one 3x3-stencil conv stage (grid over whole-image tiles)."""
    cin, m = x_flat.shape
    cout = taps.shape[1]
    img_pix = h * w
    lane_bytes = (cin + 4) * jnp.dtype(compute_dtype).itemsize \
        + cout * jnp.dtype(out_dtype).itemsize
    if images_per_tile is None:
        images_per_tile = _pick_images_per_tile(n_images, img_pix, lane_bytes)
    assert n_images % images_per_tile == 0
    tile = images_per_tile * img_pix
    assert tile == m or tile % 128 == 0, (tile, m)   # (8,128) lane rule
    grid = (m // tile,)

    mt, mb, ml, mr = _boundary_masks(h, w, tile, compute_dtype)
    kern = functools.partial(_conv3x3_stats_kernel, img_w=w, add_bias=add_bias,
                             in_affine_relu=in_affine_relu, np_roll=_roll_matches_np(),
                             cdtype=compute_dtype)
    y, s, q = pl.pallas_call(
        kern,
        out_shape=(jax.ShapeDtypeStruct((cout, m), out_dtype),
                   jax.ShapeDtypeStruct((cout, 1), jnp.float32),
                   jax.ShapeDtypeStruct((cout, 1), jnp.float32)),
        grid=grid,
        in_specs=[
            pl.BlockSpec((cin, tile), lambda i: (0, i)),         # x tile
            pl.BlockSpec((9, cout, cin), lambda i: (0, 0, 0)),   # taps
            pl.BlockSpec((cout, 1), lambda i: (0, 0)),           # bias
            pl.BlockSpec((cin, 1), lambda i: (0, 0)),            # input scale
            pl.BlockSpec((cin, 1), lambda i: (0, 0)),            # input shift
            pl.BlockSpec((1, tile), lambda i: (0, 0)),           # mask y >= 1
            pl.BlockSpec((1, tile), lambda i: (0, 0)),           # mask y <= H-2
            pl.BlockSpec((1, tile), lambda i: (0, 0)),           # mask x >= 1
            pl.BlockSpec((1, tile), lambda i: (0, 0)),           # mask x <= W-2
        ],
        out_specs=(
            pl.BlockSpec((cout, tile), lambda i: (0, i)),        # raw conv output
            pl.BlockSpec((cout, 1), lambda i: (0, 0)),           # resident sum accumulator
            pl.BlockSpec((cout, 1), lambda i: (0, 0)),           # resident sumsq accumulator
        ),
        compiler_params=pltpu.CompilerParams(
            dimension_semantics=("arbitrary",),     # stats accumulate across the lane grid
            vmem_limit_bytes=VMEM_LIMIT_BYTES),
    )(x_flat, taps, bias, s_in, t_in, mt, mb, ml, mr)
    return y, s, q


# --------------------------------------------------------------------------------------
# Forward pass
# --------------------------------------------------------------------------------------
def upproject_forward(x, params, *, compute_dtype=jnp.float32,
                      images_per_tile=None, out_tile=None, packed=None):
    """UpProject forward (train-mode BatchNorm), matching the PyTorch module.

    Pass `packed=pack_upproject_params(params, compute_dtype)` to hoist weight packing
    out of per-step calls entirely.
    """
    if packed is None:
        packed = pack_upproject_params(params, compute_dtype)
    cout, cin = packed["cout"], packed["cin"]
    n, cin_x, h, w = x.shape
    assert cin_x == cin
    h2, w2 = 2 * h, 2 * w
    m, m2 = n * h * w, n * h2 * w2
    f32 = jnp.float32

    # ---- layout glue: NCHW -> (cin, N*H*W); flattened spatial on the lane axis ----
    x_flat = jnp.transpose(x.astype(compute_dtype), (1, 0, 2, 3)).reshape(cin, m)

    # ---- stage 1: all 8 convs (one set of zero-embedded 3x3 taps) + bn1_* statistics ----
    dummy_in = jnp.zeros((cin, 1), f32)
    y1, s1, q1 = _conv3x3_stats(
        x_flat, packed["w1"], packed["b1"], dummy_in, dummy_in,
        h=h, w=w, n_images=n, add_bias=True, in_affine_relu=False,
        out_dtype=compute_dtype, compute_dtype=compute_dtype,
        images_per_tile=images_per_tile)

    # tiny per-channel BN math (XLA): each BN channel pools its 4 interleaved convs
    s_bc = s1.reshape(2, NCONV, cout).sum(axis=1)              # (2, cout)
    q_bc = q1.reshape(2, NCONV, cout).sum(axis=1)
    count1 = float(NCONV * m)                                  # = N * 2H * 2W per channel
    sc_b1, sh_b1 = _scale_shift(s_bc[0:1].T, q_bc[0:1].T, count1,
                                packed["g1_1"], packed["be1_1"])
    sc_b2, sh_b2 = _scale_shift(s_bc[1:2].T, q_bc[1:2].T, count1,
                                packed["g1_2"], packed["be1_2"])

    # ---- layout glue: 2x pixel-shuffle interleave (pure data movement, raw activations) --
    y1s = _pixel_shuffle(y1[:NCONV * cout], cout, n, h, w)     # branch 1, pre-bn1_1
    y2s = _pixel_shuffle(y1[NCONV * cout:], cout, n, h, w)     # branch 2, pre-bn1_2

    # ---- stage 2: conv3 on relu(bn1_1(.)) (bn1_1 + ReLU fused into the conv kernel) ----
    # conv3's bias is dropped: exactly cancelled by train-mode bn2 mean subtraction.
    y3, s3, q3 = _conv3x3_stats(
        y1s, packed["w3"], jnp.zeros((cout, 1), f32), sc_b1, sh_b1,
        h=h2, w=w2, n_images=n, add_bias=False, in_affine_relu=True,
        out_dtype=f32, compute_dtype=compute_dtype,
        images_per_tile=images_per_tile)
    sc_bn2, sh_bn2 = _scale_shift(s3, q3, float(m2), packed["g2"], packed["be2"])

    # ---- stage 3: bn2 + bn1_2(branch2) + add + final ReLU ("parallel" -> both v7x TCs) ----
    if out_tile is None:
        out_tile = _pick_lane_tile(m2, 3 * cout * 4)
    assert m2 % out_tile == 0 and (out_tile == m2 or out_tile % 128 == 0)
    out_flat = pl.pallas_call(
        _bn_apply_add_relu_kernel,
        out_shape=jax.ShapeDtypeStruct((cout, m2), f32),
        grid=(m2 // out_tile,),
        in_specs=[
            pl.BlockSpec((cout, out_tile), lambda i: (0, i)),
            pl.BlockSpec((cout, out_tile), lambda i: (0, i)),
            pl.BlockSpec((cout, 1), lambda i: (0, 0)),
            pl.BlockSpec((cout, 1), lambda i: (0, 0)),
            pl.BlockSpec((cout, 1), lambda i: (0, 0)),
            pl.BlockSpec((cout, 1), lambda i: (0, 0)),
        ],
        out_specs=pl.BlockSpec((cout, out_tile), lambda i: (0, i)),
        compiler_params=pltpu.CompilerParams(
            dimension_semantics=("parallel",),
            vmem_limit_bytes=VMEM_LIMIT_BYTES),
    )(y3, y2s, sc_bn2, sh_bn2, sc_b2, sh_b2)

    # ---- layout glue: back to NCHW ----
    return jnp.transpose(out_flat.reshape(cout, n, h2, w2), (1, 0, 2, 3))


# --------------------------------------------------------------------------------------
# Pure-JAX reference matching the PyTorch module (train-mode BatchNorm)
# --------------------------------------------------------------------------------------
def _conv_ref(x, w, b, pad):
    t, bb, l, r = pad
    y = jax.lax.conv_general_dilated(
        x, w, window_strides=(1, 1), padding=((t, bb), (l, r)),
        dimension_numbers=("NCHW", "OIHW", "NCHW"))
    return y + b.reshape(1, -1, 1, 1)


def _bn_train_ref(y, g, be):
    mean = jnp.mean(y, axis=(0, 2, 3), keepdims=True)
    var = jnp.mean(jnp.square(y - mean), axis=(0, 2, 3), keepdims=True)
    return g.reshape(1, -1, 1, 1) * (y - mean) * jax.lax.rsqrt(var + EPS) + be.reshape(1, -1, 1, 1)


def _interleave_ref(o1, o2, o3, o4):
    n, c, h, w = o1.shape
    o12 = jnp.transpose(jnp.stack((o1, o2), axis=-3), (0, 1, 3, 4, 2)).reshape(n, c, h, 2 * w)
    o34 = jnp.transpose(jnp.stack((o3, o4), axis=-3), (0, 1, 3, 4, 2)).reshape(n, c, h, 2 * w)
    return jnp.transpose(jnp.stack((o12, o34), axis=-3), (0, 1, 3, 2, 4)).reshape(n, c, 2 * h, 2 * w)


def reference_forward(x, params):
    x = x.astype(jnp.float32)
    o1 = [_conv_ref(x, params[f"w1_{j + 1}"], params[f"b1_{j + 1}"], PADS[j]) for j in range(NCONV)]
    o2 = [_conv_ref(x, params[f"w2_{j + 1}"], params[f"b2_{j + 1}"], PADS[j]) for j in range(NCONV)]
    out1_1234 = _interleave_ref(*o1)
    out2_1234 = _interleave_ref(*o2)
    out1 = jnp.maximum(_bn_train_ref(out1_1234, params["g1_1"], params["be1_1"]), 0.0)
    out1 = _conv_ref(out1, params["w3"], params["b3"], (1, 1, 1, 1))
    out1 = _bn_train_ref(out1, params["g2"], params["be2"])
    out2 = _bn_train_ref(out2_1234, params["g1_2"], params["be1_2"])
    return jnp.maximum(out1 + out2, 0.0)


# --------------------------------------------------------------------------------------
if __name__ == "__main__":
    N, Cin, H, W = 2, 4, 16, 16
    Cout = 8

    key = jax.random.PRNGKey(0)
    keys = iter(jax.random.split(key, 64))
    params = {}
    for branch in ("1", "2"):
        for j, (kh, kw) in enumerate(KERNEL_SIZES):
            params[f"w{branch}_{j + 1}"] = 0.1 * jax.random.normal(
                next(keys), (Cout, Cin, kh, kw), jnp.float32)
            params[f"b{branch}_{j + 1}"] = 0.1 * jax.random.normal(next(keys), (Cout,), jnp.float32)
    params["w3"] = 0.1 * jax.random.normal(next(keys), (Cout, Cout, 3, 3), jnp.float32)
    params["b3"] = 0.1 * jax.random.normal(next(keys), (Cout,), jnp.float32)
    for name in ("g1_1", "g1_2", "g2"):
        params[name] = 1.0 + 0.1 * jax.random.normal(next(keys), (Cout,), jnp.float32)
    for name in ("be1_1", "be1_2", "be2"):
        params[name] = 0.1 * jax.random.normal(next(keys), (Cout,), jnp.float32)

    x = jax.random.normal(next(keys), (N, Cin, H, W), jnp.float32)
    ref = reference_forward(x, params)

    # f32 path; small explicit tiles so the multi-step grids (stats accumulation across
    # "arbitrary" steps + "parallel" apply pass) are actually exercised at toy shapes.
    out = jax.block_until_ready(
        upproject_forward(x, params, images_per_tile=1, out_tile=512))
    assert out.shape == (N, Cout, 2 * H, 2 * W), out.shape
    err = float(jnp.max(jnp.abs(out - ref)))
    assert jnp.allclose(out, ref, atol=1e-4, rtol=1e-4), err

    # bf16 matmul path (BN statistics / scale-shift stay f32); loose tolerance for bf16.
    out_bf16 = jax.block_until_ready(
        upproject_forward(x, params, compute_dtype=jnp.bfloat16))
    err_bf16 = float(jnp.max(jnp.abs(out_bf16 - ref)))
    assert jnp.allclose(out_bf16, ref, atol=1e-1, rtol=1e-1), err_bf16

    print("KERNEL_OK")
</pallas_src>

<mosaic_0001>
module attributes {stable_mosaic.version = 11 : i64} {
  func.func @k(%arg0: memref<8x128xf32, #tpu.memory_space<vmem>>, %arg1: memref<8x128xf32, #tpu.memory_space<vmem>>) attributes {dimension_semantics = [], scalar_prefetch = 0 : i64, scratch_operands = 0 : i64, tpu.core_type = #tpu.core_type<tc>} {
    %c0 = arith.constant 0 : index
    %c0_0 = arith.constant 0 : index
    %0 = vector.load %arg0[%c0, %c0_0] : memref<8x128xf32, #tpu.memory_space<vmem>>, vector<8x128xf32>
    %c1_i32 = arith.constant 1 : i32
    %1 = tpu.dynamic_rotate %0 by %c1_i32 dim 1 : vector<8x128xf32>, i32 -> vector<8x128xf32>
    %c0_1 = arith.constant 0 : index
    %c0_2 = arith.constant 0 : index
    %2 = vector.load %arg1[%c0_1, %c0_2] : memref<8x128xf32, #tpu.memory_space<vmem>>, vector<8x128xf32>
    tpu.vector_store %arg1[%c0_1, %c0_2], %1 {strides = array<i32>} : memref<8x128xf32, #tpu.memory_space<vmem>>, vector<8x128xf32>,
    return
  }
}

</mosaic_0001>

<bundles_post_ra>
// kernel: tpu_custom_call.1
= control target key start
LH: loop header
LB: loop body
LE: loop exit
PB: predicated region body
PF: predicated region fallthrough
CT: control target
= control target key end

     0   :  { %6 = vsyncpa [#allocation3], 0  ;;  %s128_s0 = inlined_call_operand.hbm [shape: f32[8,128], index: 0, kind: input, shape index: {}]   ;;  %s129_s1 = inlined_call_operand.hbm [shape: f32[8,128], index: 1, kind: output, shape index: {}]  }
   0x1   :  { %7 = vsyncpa [#allocation4], 0  ;;  %s91_s6 = smov [#allocation2]   ;;  %s43_s10 = scalar_lea.hbm %s128_s0, 128 }
   0x2   :  { %s14_s7 = sshll.u32 %s91_s6, 4  ;;  %p44_p0 = scmp.ne.s32.totalorder %s128_s0, %s43_s10  ;;  %s15_s7 = int_to_ptr.vmem [resolvable:$true] %s14_s7 }
   0x3   :  { %p47_p1 = scmp.lt.u32.totalorder %s43_s10, %s128_s0 }
   0x5   :  { %p49_p2 = pnand %p47_p1, %p44_p0 }
   0x7   :  { %52 = shalt.err (!%p49_p2)
}
   0x8   :  { %s53_s15 = scalar_lea.vmem %s15_s7, 128  ;;  %p58_p4 = scmp.lt.s32.totalorder %s15_s7, %s15_s7 }
   0x9   :  { %p54_p3 = scmp.ne.s32.totalorder %s15_s7, %s53_s15  ;;  %p59_p5 = scmp.lt.s32.totalorder %s53_s15, %s53_s15 }
   0xb   :  { %p60_p6 = por %p59_p5, %p58_p4 }
   0xd   :  { %p61_p7 = pnand %p60_p6, %p54_p3 }
   0xf   :  { %64 = shalt.err (!%p61_p7)
}
  0x10   :  { %17 = dma.hbm_to_vmem [thread:$0]  %s128_s0, 128, %s15_s7, [#allocation3]  }
  0x11   :  { %87 = dma.done.wait [#allocation3], 128  }
  0x12   :  { %88 = vsyncadd [#allocation3], 4294967168  ;;  %v21_v0 = vld [vmem:[#allocation2] sm:$0xff]  ;;  %s92_s18 = smov 1   ;;  %s93_s19 = smov [#allocation5]  }
  0x13   :  { %22 = vrot.lane.b32.xlu0 %v21_v0, %s92_s18  ;;  %s31_s20 = sshll.u32 %s93_s19, 4  ;;  %s32_s20 = int_to_ptr.vmem [resolvable:$true] %s31_s20 }
  0x14   :  { %s65_s21 = scalar_lea.vmem %s32_s20, 128  ;;  %p70_p9 = scmp.lt.s32.totalorder %s32_s20, %s32_s20 }
  0x15   :  { %p66_p8 = scmp.ne.s32.totalorder %s32_s20, %s65_s21  ;;  %p71_p10 = scmp.lt.s32.totalorder %s65_s21, %s65_s21 }
  0x17   :  { %p72_p11 = por %p71_p10, %p70_p9 }
  0x19   :  { %p73_p12 = pnand %p72_p11, %p66_p8 }
  0x85   :  { %v23_v1 = vpop.permute.xlu0 %22 }
  0x86   :  { %24 = vst [vmem:[#allocation5] sm:$0xff] %v23_v1 }
  0x87   :  { %76 = shalt.err (!%p73_p12)
}
  0x88   :  { %s77_s0 = scalar_lea.hbm %s129_s1, 128 }
  0x89   :  { %p78_p13 = scmp.ne.s32.totalorder %s129_s1, %s77_s0  ;;  %p81_p0 = scmp.lt.u32.totalorder %s77_s0, %s129_s1 }
  0x8b   :  { %p83_p1 = pnand %p81_p0, %p78_p13 }
  0x8d   :  { %86 = shalt.err (!%p83_p1)
}
  0x8e   :  { %34 = dma.vmem_to_hbm [thread:$0]  %s32_s20, 128, %s129_s1, [#allocation4]  }
  0x8f   :  { %89 = dma.done.wait [#allocation4], 128  }
  0x90   :  { %90 = vsyncadd [#allocation4], 4294967168 }
  0x91   :  { %38 = vsyncpa [#allocation3], 1 }
  0x92   :  { %39 = vsyncpa [#allocation4], 1 }

</bundles_post_ra>
